<compile_context>
chip_gen: v6e
topology: v6e:2x2x1
jax: 0.10.0
libtpu: 0.0.40
codegen_flags: <defaults>
</compile_context>

<pallas_src>
import jax
import jax.numpy as jnp
from jax.experimental import pallas as pl
from jax.experimental.pallas import tpu as pltpu


class _DemoException(Exception):
    pass


def _round_up(x: int, m: int) -> int:
    return ((x + m - 1) // m) * m


def _pick_tile(total: int, candidates) -> int:
    """Largest candidate that evenly divides `total`."""
    for c in candidates:
        if total % c == 0:
            return c
    return total  # fallback: single tile


# ----------------------------------------------------------------------------
# Kernels
# ----------------------------------------------------------------------------
def _small_linear_kernel(x_ref, w_ref, b_ref, o_ref):
    # Whole problem in VMEM: x [M, D], w [D, D'], b [1, D'], o [M, D'].
    o_ref[...] = (
        jnp.dot(x_ref[...], w_ref[...], preferred_element_type=jnp.float32)
        + b_ref[...]
    ).astype(o_ref.dtype)


def _tiled_linear_kernel(x_ref, w_ref, b_ref, o_ref):
    # x_ref: [tm, tk], w_ref: [tk, tn], b_ref: [1, tn], o_ref: [tm, tn] (f32).
    # Output block is VMEM-resident across the K axis -> accumulate in place.
    k = pl.program_id(2)

    @pl.when(k == 0)
    def _():
        o_ref[...] = jnp.broadcast_to(b_ref[...], o_ref.shape).astype(o_ref.dtype)

    o_ref[...] += jnp.dot(
        x_ref[...], w_ref[...], preferred_element_type=jnp.float32
    )


# ----------------------------------------------------------------------------
# Wrapper
# ----------------------------------------------------------------------------
_SMALL_PATH_BYTES = 4 * 1024 * 1024  # whole-problem-in-VMEM threshold


def linear_pallas(x2d, w, b, w_pad, b_pad):
    """y = x2d @ w + b.

    x2d: [M, D] f32, w: [D, D'] f32, b: [1, D'] f32.
    w_pad/b_pad: lane-aligned copies ([K_pad, N_pad] / [1, N_pad]) prepared
    once at init time (used only by the tiled path).
    """
    M, D = x2d.shape
    Dp = w.shape[1]

    # ---- Small/unaligned fast path: single call, full-extent blocks. -------
    total_bytes = 4 * (M * D + D * Dp + M * Dp + Dp)
    if total_bytes <= _SMALL_PATH_BYTES:
        return pl.pallas_call(
            _small_linear_kernel,
            out_shape=jax.ShapeDtypeStruct((M, Dp), x2d.dtype),
            in_specs=[pl.BlockSpec(memory_space=pltpu.MemorySpace.VMEM)] * 3,
            out_specs=pl.BlockSpec(memory_space=pltpu.MemorySpace.VMEM),
        )(x2d, w, b)

    # ---- General tiled path. ------------------------------------------------
    K_pad, N_pad = w_pad.shape

    # Only the contraction dim of x may need padding (zeros are matmul-neutral
    # against the zero-padded weight rows). No M padding, no output slicing.
    if D != K_pad:
        x2d = jnp.pad(x2d, ((0, 0), (0, K_pad - D)))

    tm = min(512, _round_up(M, 8))
    tn = _pick_tile(N_pad, (512, 384, 256, 128))
    tk = _pick_tile(K_pad, (1024, 512, 256, 128))

    # Ragged M / N boundary blocks are masked by Pallas on store; padded W/B
    # columns contribute zeros, so out_shape is exactly (M, Dp).
    grid = (pl.cdiv(M, tm), pl.cdiv(Dp, tn), K_pad // tk)

    return pl.pallas_call(
        _tiled_linear_kernel,
        out_shape=jax.ShapeDtypeStruct((M, Dp), x2d.dtype),
        grid_spec=pltpu.PrefetchScalarGridSpec(
            num_scalar_prefetch=0,
            grid=grid,
            in_specs=[
                pl.BlockSpec((tm, tk), lambda i, j, k: (i, k)),   # x tile
                pl.BlockSpec((tk, tn), lambda i, j, k: (k, j)),   # w tile
                pl.BlockSpec((1, tn), lambda i, j, k: (0, j)),    # bias (per-N only)
            ],
            out_specs=pl.BlockSpec((tm, tn), lambda i, j, k: (i, j)),
        ),
        compiler_params=pltpu.CompilerParams(
            dimension_semantics=("parallel", "parallel", "arbitrary"),
            vmem_limit_bytes=48 * 1024 * 1024,  # working set ~10 MiB; safe on v7x too
        ),
    )(x2d, w_pad, b_pad)


def sub_model_forward(x, params, *, raise_like_torch: bool = False):
    """Mirror of _TestTorchSubModelRaisingException.forward. x: [B,T,D] -> [B,T,D']."""
    B, T, D = x.shape
    Dp = params["w"].shape[1]
    y2d = linear_pallas(x.reshape(B * T, D), params["w"], params["b"],
                        params["w_pad"], params["b_pad"])
    y = y2d.reshape(B, T, Dp)
    if raise_like_torch:
        # TODO(synk): the module's unconditional `raise _DemoException('uh')` is
        # host-side Python control flow; no on-device Pallas equivalent.
        raise _DemoException("uh")
    return y


def init_linear_params(key, in_features: int, out_features: int):
    """torch.nn.Linear-style init; weight stored transposed as [D, D'].

    Also pre-pads the (static) weight/bias to lane-aligned shapes ONCE, so the
    per-forward tiled path never re-pads parameters.
    """
    kw, kb = jax.random.split(key)
    bound = 1.0 / jnp.sqrt(jnp.float32(in_features))
    w = jax.random.uniform(kw, (in_features, out_features), jnp.float32,
                           minval=-bound, maxval=bound)
    b = jax.random.uniform(kb, (1, out_features), jnp.float32,
                           minval=-bound, maxval=bound)
    K_pad = _round_up(in_features, 128)
    N_pad = _round_up(out_features, 128)
    w_pad = jnp.pad(w, ((0, K_pad - in_features), (0, N_pad - out_features)))
    b_pad = jnp.pad(b, ((0, 0), (0, N_pad - out_features)))
    return {"w": w, "b": b, "w_pad": w_pad, "b_pad": b_pad}


if __name__ == "__main__":
    key = jax.random.PRNGKey(0)
    k_x, k_p, k_x2, k_p2 = jax.random.split(key, 4)

    # ---- Demo shape from the module's test (small fast path). ---------------
    B, T, D, Dp = 2, 8, 32, 32
    x = jax.random.normal(k_x, (B, T, D), dtype=jnp.float32)
    params = init_linear_params(k_p, D, Dp)

    y = sub_model_forward(x, params, raise_like_torch=False)
    y = jax.block_until_ready(y)

    y_ref = (x.reshape(B * T, D) @ params["w"] + params["b"]).reshape(B, T, Dp)
    assert y.shape == (B, T, Dp)
    assert jnp.allclose(y, y_ref, atol=1e-5, rtol=1e-5)

    # ---- Larger shape to exercise the tiled path. ----------------------------
    B2, T2, D2, Dp2 = 4, 512, 256, 384
    x2 = jax.random.normal(k_x2, (B2, T2, D2), dtype=jnp.float32)
    params2 = init_linear_params(k_p2, D2, Dp2)

    y2 = sub_model_forward(x2, params2, raise_like_torch=False)
    y2 = jax.block_until_ready(y2)

    y2_ref = (x2.reshape(B2 * T2, D2) @ params2["w"] + params2["b"]).reshape(B2, T2, Dp2)
    assert y2.shape == (B2, T2, Dp2)
    assert jnp.allclose(y2, y2_ref, atol=1e-3, rtol=1e-3)

    # ---- Reproduce the module's exception-raising behavior on the host. -----
    try:
        sub_model_forward(x, params, raise_like_torch=True)
    except _DemoException:
        pass  # expected, matches torch forward semantics

    print("KERNEL_OK")
</pallas_src>

<mosaic_0001>
module attributes {stable_mosaic.version = 11 : i64} {
  func.func @_small_linear_kernel(%arg0: memref<16x32xf32, #tpu.memory_space<vmem>>, %arg1: memref<32x32xf32, #tpu.memory_space<vmem>>, %arg2: memref<1x32xf32, #tpu.memory_space<vmem>>, %arg3: memref<16x32xf32, #tpu.memory_space<vmem>>) attributes {dimension_semantics = [], scalar_prefetch = 0 : i64, scratch_operands = 0 : i64, tpu.core_type = #tpu.core_type<tc>} {
    %c0 = arith.constant 0 : index
    %c0_0 = arith.constant 0 : index
    %0 = vector.load %arg0[%c0, %c0_0] : memref<16x32xf32, #tpu.memory_space<vmem>>, vector<16x32xf32>
    %c0_1 = arith.constant 0 : index
    %c0_2 = arith.constant 0 : index
    %1 = vector.load %arg1[%c0_1, %c0_2] : memref<32x32xf32, #tpu.memory_space<vmem>>, vector<32x32xf32>
    %cst = arith.constant dense<0.000000e+00> : vector<16x32xf32>
    %2 = tpu.matmul %0, %1, %cst {dimension_numbers = #tpu.dot_dimension_numbers<[1], [0], [0], [1], [0, 0, 1, 1], [], []>} : vector<16x32xf32>, vector<32x32xf32>, vector<16x32xf32> -> vector<16x32xf32>
    %c0_3 = arith.constant 0 : index
    %c0_4 = arith.constant 0 : index
    %3 = vector.load %arg2[%c0_3, %c0_4] : memref<1x32xf32, #tpu.memory_space<vmem>>, vector<1x32xf32>
    %4 = vector.broadcast %3 : vector<1x32xf32> to vector<16x32xf32>
    %5 = arith.addf %2, %4 : vector<16x32xf32>
    %c0_5 = arith.constant 0 : index
    %c0_6 = arith.constant 0 : index
    %6 = vector.load %arg3[%c0_5, %c0_6] : memref<16x32xf32, #tpu.memory_space<vmem>>, vector<16x32xf32>
    tpu.vector_store %arg3[%c0_5, %c0_6], %5 {strides = array<i32>} : memref<16x32xf32, #tpu.memory_space<vmem>>, vector<16x32xf32>,
    return
  }
}

</mosaic_0001>

<bundles_post_ra>
// kernel: tpu_custom_call.1
= control target key start
LH: loop header
LB: loop body
LE: loop exit
PB: predicated region body
PF: predicated region fallthrough
CT: control target
= control target key end

     0   :  { %8 = vsyncpa [#allocation3], 0  ;;  %s299_s0 = inlined_call_operand.hbm [shape: f32[16,32], index: 0, kind: input, shape index: {}]   ;;  %s300_s1 = inlined_call_operand.hbm [shape: f32[32,32], index: 1, kind: input, shape index: {}]   ;;  %s301_s2 = inlined_call_operand.vmem [shape: f32[1,32], index: 2, kind: input, shape index: {}]   ;;  %s302_s3 = inlined_call_operand.hbm [shape: f32[16,32], index: 3, kind: output, shape index: {}]  }
   0x1   :  { %9 = vsyncpa [#allocation6], 0 }
   0x2   :  { %10 = vsyncpa [#allocation4], 0  ;;  %s249_s12 = smov [#allocation2]  }
   0x3   :  { %s16_s13 = sshll.u32 %s249_s12, 4  ;;  %s17_s13 = int_to_ptr.vmem [resolvable:$true] %s16_s13 }
   0x4   :  { %s191_s14 = scalar_lea.vmem %s17_s13, 256  ;;  %p196_p1 = scmp.lt.s32.totalorder %s17_s13, %s17_s13 }
   0x5   :  { %p192_p0 = scmp.ne.s32.totalorder %s17_s13, %s191_s14  ;;  %p197_p2 = scmp.lt.s32.totalorder %s191_s14, %s191_s14 }
   0x7   :  { %p198_p3 = por %p197_p2, %p196_p1 }
   0x9   :  { %p199_p4 = pnand %p198_p3, %p192_p0 }
   0xb   :  { %202 = shalt.err (!%p199_p4)
}
   0xc   :  { %s250_s15 = smov 128   ;;  %s251_s16 = smov 8  }
   0xd   :  { %22 = dma.hbm_to_vmem [thread:$0]  %s299_s0, 256, %s17_s13, [#allocation3], %s250_s15, %s250_s15, %s251_s16  }
   0xe   :  { %s252_s19 = smov [#allocation5]  }
   0xf   :  { %s28_s20 = sshll.u32 %s252_s19, 4  ;;  %s29_s20 = int_to_ptr.vmem [resolvable:$true] %s28_s20 }
  0x10   :  { %s211_s21 = scalar_lea.vmem %s29_s20, 512  ;;  %p216_p6 = scmp.lt.s32.totalorder %s29_s20, %s29_s20 }
  0x11   :  { %p212_p5 = scmp.ne.s32.totalorder %s29_s20, %s211_s21  ;;  %p217_p7 = scmp.lt.s32.totalorder %s211_s21, %s211_s21 }
  0x13   :  { %p218_p8 = por %p217_p7, %p216_p6 }
  0x15   :  { %p219_p9 = pnand %p218_p8, %p212_p5 }
  0x17   :  { %222 = shalt.err (!%p219_p9)
}
  0x18   :  { %34 = dma.hbm_to_vmem [thread:$0]  %s300_s1, 512, %s29_s20, [#allocation6], %s250_s15, %s250_s15, %s251_s16  }
  0x19   :  { %243 = dma.done.wait [#allocation3], 256  }
  0x1a   :  { %244 = vsyncadd [#allocation3], 4294967040 }
  0x1b   :  { %245 = dma.done.wait [#allocation6], 512  }
  0x1c   :  { %246 = vsyncadd [#allocation6], 4294966784  ;;  %vm56_vm0 = vcmask 261120   ;;  %v48_v0 = vld [vmem:[#allocation5 + $0x18] sm:$0xff]  ;;  %v47_v1 = vld [vmem:[#allocation5 + $0x10] sm:$0xff]  ;;  %s253_s24 = smov [#allocation7]  }
  0x1d   :  { %167 = vmatprep.subr.mxu0 %v48_v0  ;;  %v43_v2 = vld [vmem:[#allocation2] sm:$0xff]  ;;  %v46_v3 = vld [vmem:[#allocation5 + $0x8] sm:$0xff]  ;;  %v45_v4 = vld [vmem:[#allocation5] sm:$0xff]  ;;  %s145_s25 = sshll.u32 %s253_s24, 4  ;;  %s146_s25 = int_to_ptr.vmem [resolvable:$true] %s145_s25 }
  0x1e   :  { %168 = vmatpush3.msra.mxu0 %v48_v0  ;;  %175 = vmatprep.mubr.msk.f32.mxu0 %vm56_vm0, %v43_v2  ;;  %v44_v5 = vld [vmem:[#allocation2 + $0x8] sm:$0xff]  ;;  %v158_v6 = vld [vmem:[%s301_s2] ss:$0 sm:$0xff]  ;;  %s223_s26 = scalar_lea.vmem %s146_s25, 256  ;;  %p228_p11 = scmp.lt.s32.totalorder %s146_s25, %s146_s25 }
  0x1f   :  { %169 = vmatprep.subr.mxu0 %v47_v1  ;;  %p224_p10 = scmp.ne.s32.totalorder %s146_s25, %s223_s26  ;;  %p229_p12 = scmp.lt.s32.totalorder %s223_s26, %s223_s26 }
  0x20   :  { %170 = vmatpush3.msra.mxu0 %v47_v1 }
  0x21   :  { %171 = vmatprep.subr.mxu0 %v46_v3  ;;  %p230_p13 = por %p229_p12, %p228_p11 }
  0x22   :  { %172 = vmatpush3.msra.mxu0 %v46_v3 }
  0x23   :  { %173 = vmatprep.subr.mxu0 %v45_v4  ;;  %p231_p0 = pnand %p230_p13, %p224_p10 }
  0x24   :  { %174 = vmatpush3.msra.mxu0 %v45_v4 }
  0x25   :  { %176 = vmatmul.mubr.msk.f32.vlgmr.msra.gmra.mxu0 %vm56_vm0, %v44_v5 }
  0xe5   :  { %v177_v7 = vpop.f32.mrf.mxu0 }
  0xe6   :  { %v135_v8 = vadd.f32 %v177_v7, %v158_v6 }
  0xe7   :  { %v129_v9 = vpop.f32.mrf.mxu0 }
  0xe8   :  { %139 = vst.msk [vmem:[#allocation7 + $0x8] sm:$0xff] %vm56_vm0, %v135_v8  ;;  %v130_v10 = vadd.f32 %v158_v6, %v129_v9 }
  0xea   :  { %138 = vst.msk [vmem:[#allocation7] sm:$0xff] %vm56_vm0, %v130_v10 }
  0xeb   :  { %234 = shalt.err (!%p231_p0)
}
  0xec   :  { %151 = dma.vmem_to_hbm [thread:$0]  %s146_s25, 256, %s302_s3, [#allocation4], %s250_s15, %s250_s15, %s251_s16  }
  0xed   :  { %247 = dma.done.wait [#allocation4], 256  }
  0xee   :  { %248 = vsyncadd [#allocation4], 4294967040 }
  0xef   :  { %155 = vsyncpa [#allocation3], 1 }
  0xf0   :  { %156 = vsyncpa [#allocation6], 1 }
  0xf1   :  { %157 = vsyncpa [#allocation4], 1 }

</bundles_post_ra>
